<compile_context>
chip_gen: v5e
topology: v5e:2x2
jax: 0.10.0
libtpu: 0.0.40
codegen_flags: <defaults>
</compile_context>

<pallas_src>
import functools

import jax
import jax.numpy as jnp
from jax import lax
from jax.experimental import pallas as pl
from jax.experimental.pallas import tpu as pltpu


def _round_up(x, m):
    return ((x + m - 1) // m) * m


# -----------------------------------------------------------------------------
# Kernel 1: down conv — in-kernel im2col (contiguous slices only) + matmul.
# -----------------------------------------------------------------------------
def _downconv_kernel(xe_ref, xo_ref, w_ref, o_ref):
    """Conv2d(k=4, s=2, p=1, bias=False) for one image.

    xe_ref / xo_ref : (Ho+1, Wo+1, 2*Cin) bf16 — even / odd padded rows of the
        LeakyReLU'd NHWC image with the W axis pre-folded as (col_pair, 2*Cin).
        For output (oh, ow) the 4x4 window splits into 8 slabs: kh picks
        even/odd rows plus a row-pair shift dh, the kw pair lives in the folded
        channel axis with a col-pair shift dw — so only static contiguous
        slices are needed (no strided loads, no HBM patch matrix).
    w_ref : (16*Cin, Cop) bf16, rows ordered (kh, kw, ci), Cop lane-padded.
    o_ref : (Ho*Wo, Cop) f32.
    """
    hp1, wp1, two_c = xe_ref.shape
    ho, wo = hp1 - 1, wp1 - 1
    acc = jnp.zeros(o_ref.shape, jnp.float32)
    for kh in range(4):
        src = xe_ref if kh % 2 == 0 else xo_ref
        dh = kh // 2                                    # row-pair shift
        for dw in range(2):                             # col-pair shift
            part = src[dh:dh + ho, dw:dw + wo, :]       # (Ho, Wo, 2*Cin)
            lhs = part.reshape(ho * wo, two_c)
            off = (kh * 2 + dw) * two_c                 # K segment in (kh,kw,ci)
            acc = acc + jnp.dot(lhs, w_ref[off:off + two_c, :],
                                preferred_element_type=jnp.float32)
    o_ref[...] = acc.astype(o_ref.dtype)


def downconv(w_down, x):
    """LeakyReLU(0.2) -> Conv2d(k=4, s=2, p=1, bias=False); x NCHW (B,Cin,H,W)."""
    B, Cin, H, W = x.shape
    inner = w_down.shape[0]
    Ho, Wo = H // 2, W // 2
    Cop = _round_up(inner, 128)          # lane-dense weight/output columns
    # One fused XLA prep pass over x: LeakyReLU + NCHW->NHWC + pad + bf16 cast
    # + (free) parity reshape.  Total HBM traffic ~= one read + one write of x.
    x_act = jnp.where(x >= 0, x, 0.2 * x)
    xp = jnp.pad(x_act.transpose(0, 2, 3, 1), ((0, 0), (1, 1), (1, 1), (0, 0)))
    xr = xp.reshape(B, Ho + 1, 2, Wo + 1, 2 * Cin).astype(jnp.bfloat16)
    x_even = xr[:, :, 0]                 # (B, Ho+1, Wo+1, 2*Cin)
    x_odd = xr[:, :, 1]
    wd = w_down.transpose(2, 3, 1, 0).reshape(16 * Cin, inner)   # (kh,kw,ci) x O
    wd_p = jnp.pad(wd, ((0, 0), (0, Cop - inner))).astype(jnp.bfloat16)

    out = pl.pallas_call(
        _downconv_kernel,
        out_shape=jax.ShapeDtypeStruct((B, Ho * Wo, Cop), jnp.float32),
        grid=(B,),
        in_specs=[
            pl.BlockSpec((None, Ho + 1, Wo + 1, 2 * Cin), lambda b: (b, 0, 0, 0)),
            pl.BlockSpec((None, Ho + 1, Wo + 1, 2 * Cin), lambda b: (b, 0, 0, 0)),
            pl.BlockSpec((16 * Cin, Cop), lambda b: (0, 0)),
        ],
        out_specs=pl.BlockSpec((None, Ho * Wo, Cop), lambda b: (b, 0, 0)),
        compiler_params=pltpu.CompilerParams(
            dimension_semantics=("parallel",)),      # batch across TCs on v7x
    )(x_even, x_odd, wd_p)
    # TODO(synk): for very large H, row-band the per-image block (2-row halo)
    # to bound VMEM; unnecessary at these sizes.
    return out[:, :, :inner].reshape(B, Ho, Wo, inner).transpose(0, 3, 1, 2)


# -----------------------------------------------------------------------------
# Kernel 2: fused style path — down matmul (central taps), ReLU, per-position
# up matmuls, two-pass BatchNorm.  One launch, enc never round-trips HBM.
# -----------------------------------------------------------------------------
def _style_fused_kernel(x_ref, s_ref, wd_ref, wus_ref, wue_ref, g_ref, b_ref,
                        enc_ref, dec_ref, *, n_stat, eps):
    """x_ref (B,4*Cin) f32 flattened NCHW 2x2 input; s_ref (B,E) style;
    wd_ref (4*Cin, inner) down-conv central taps; wus_ref/wue_ref (4,E,Co) /
    (4,inner,Co) up-conv central taps per output position (style/encode rows);
    g_ref/b_ref (1,Co) BN affine.  Outputs: enc_ref (B,inner), dec_ref (4,B,Co).
    """
    x = x_ref[...]
    xa = jnp.where(x >= 0, x, 0.2 * x)                             # LeakyReLU(0.2)
    encode = jnp.dot(xa, wd_ref[...], preferred_element_type=jnp.float32)
    enc_ref[...] = encode

    rs = jnp.maximum(s_ref[...], 0.0)                              # ReLU on cat(enc)
    re_ = jnp.maximum(encode, 0.0)

    ys = []
    s1 = jnp.zeros((1, dec_ref.shape[-1]), jnp.float32)
    for p in range(4):                                             # spatial positions
        y = (jnp.dot(rs, wus_ref[p], preferred_element_type=jnp.float32)
             + jnp.dot(re_, wue_ref[p], preferred_element_type=jnp.float32))
        ys.append(y)
        s1 = s1 + jnp.sum(y, axis=0, keepdims=True)                # sublane reduce
    mean = s1 * (1.0 / n_stat)
    s2 = jnp.zeros_like(s1)
    for p in range(4):                                             # two-pass variance
        d = ys[p] - mean
        s2 = s2 + jnp.sum(d * d, axis=0, keepdims=True)
    inv = lax.rsqrt(s2 * (1.0 / n_stat) + eps)
    g = g_ref[...]
    b = b_ref[...]
    for p in range(4):
        dec_ref[p] = (ys[p] - mean) * inv * g + b


def style_fused(params, x, style, *, eps=1e-5):
    """Fused ReLU/ConvTranspose(central taps)/BatchNorm for the 1x1 bottleneck."""
    B, Cin, H, W = x.shape
    inner = params["w_down"].shape[0]
    E = style.shape[1]
    Co = params["w_up"].shape[1]

    x_flat = x.reshape(B, Cin * 4).astype(jnp.float32)             # (ci, i, j) order
    wd_c = params["w_down"][:, :, 1:3, 1:3].reshape(inner, Cin * 4).T
    wu_taps = (params["w_up"][:, :, 1:3, 1:3]
               .transpose(2, 3, 0, 1).reshape(4, E + inner, Co))   # p=(oh*2+ow)
    wu_s = wu_taps[:, :E, :]
    wu_e = wu_taps[:, E:, :]
    gamma = params["bn_gamma"].reshape(1, Co).astype(jnp.float32)
    beta = params["bn_beta"].reshape(1, Co).astype(jnp.float32)

    encode, dec4 = pl.pallas_call(
        functools.partial(_style_fused_kernel, n_stat=float(4 * B), eps=eps),
        out_shape=(jax.ShapeDtypeStruct((B, inner), jnp.float32),
                   jax.ShapeDtypeStruct((4, B, Co), jnp.float32)),
    )(x_flat, style.astype(jnp.float32), wd_c.astype(jnp.float32),
      wu_s.astype(jnp.float32), wu_e.astype(jnp.float32), gamma, beta)

    enc_flat = jnp.concatenate([style, encode], axis=1)            # (B, E+inner)
    dec = dec4.transpose(1, 2, 0).reshape(B, Co, 2, 2)             # NCHW
    return jnp.concatenate([x, dec], axis=1), enc_flat


# -----------------------------------------------------------------------------
# Innermost UNet skip block forward
# -----------------------------------------------------------------------------
def unet_innermost_forward(params, x, style=None):
    """x: (B, input_nc, H, W) NCHW; style: (B, embedding_dim) or None."""
    if style is None:
        return downconv(params["w_down"], x)
    B, Cin, H, W = x.shape
    assert H == 2 and W == 2, "style path requires a 1x1 bottleneck (2x2 input)"
    # NOTE: reference source stores uprelu as a tuple (a bug); intended ReLU used.
    return style_fused(params, x, style)


# -----------------------------------------------------------------------------
# Pure-JAX reference (lax convolutions) for validation
# -----------------------------------------------------------------------------
def reference_forward(params, x, style=None):
    lrelu = lambda v: jnp.where(v >= 0, v, 0.2 * v)
    encode = lax.conv_general_dilated(
        lrelu(x), params["w_down"], (2, 2), ((1, 1), (1, 1)),
        dimension_numbers=("NCHW", "OIHW", "NCHW"))
    if style is None:
        return encode
    enc = jnp.concatenate([style[:, :, None, None], encode], axis=1)
    w_conv = jnp.flip(params["w_up"], axis=(2, 3)).transpose(1, 0, 2, 3)
    dec = lax.conv_general_dilated(
        jnp.maximum(enc, 0.0), w_conv, (1, 1), ((2, 2), (2, 2)),
        lhs_dilation=(2, 2), dimension_numbers=("NCHW", "OIHW", "NCHW"))
    mean = dec.mean(axis=(0, 2, 3), keepdims=True)
    var = dec.var(axis=(0, 2, 3), keepdims=True)
    dec = (dec - mean) / jnp.sqrt(var + 1e-5)
    dec = dec * params["bn_gamma"][None, :, None, None] + params["bn_beta"][None, :, None, None]
    return jnp.concatenate([x, dec], axis=1), enc.reshape(x.shape[0], -1)


# TODO(synk): outermost / middle branches of the torch module construct
# nn.Sequential from tuples/lists (and reference an undefined `up`), so they
# raise at construction time and are not reproduced here.
# TODO(synk): BatchNorm running-stat updates (buffers) are not modeled; only
# the training-mode forward math is implemented, as the module's forward uses.

if __name__ == "__main__":
    # Module config (innermost): input_nc = outer_nc = 4, inner_nc = 8,
    # embedding_dim = 32, norm = BatchNorm2d -> use_bias = False.
    outer_nc, inner_nc, input_nc, emb = 4, 8, 4, 32

    key = jax.random.PRNGKey(0)
    k1, k2, k3, k4 = jax.random.split(key, 4)
    params = {
        "w_down": 0.1 * jax.random.normal(k1, (inner_nc, input_nc, 4, 4), jnp.float32),
        "w_up":   0.1 * jax.random.normal(k2, (inner_nc + emb, outer_nc, 4, 4), jnp.float32),
        "bn_gamma": jnp.ones((outer_nc,), jnp.float32),   # PyTorch BatchNorm2d defaults
        "bn_beta":  jnp.zeros((outer_nc,), jnp.float32),
    }

    fwd = jax.jit(unet_innermost_forward)

    # Case 1: style=None, encoder-only path (any even spatial size).
    x_big = jax.random.normal(k3, (2, input_nc, 16, 16), jnp.float32)
    enc_only = jax.block_until_ready(fwd(params, x_big, None))
    enc_only_ref = reference_forward(params, x_big, None)
    assert enc_only.shape == (2, inner_nc, 8, 8)
    assert jnp.allclose(enc_only, enc_only_ref, atol=1e-2, rtol=1e-2)

    # Case 2: style given (bottleneck: spatial 2x2 -> 1x1, as the cat requires).
    x = jax.random.normal(k3, (2, input_nc, 2, 2), jnp.float32)
    style = jax.random.normal(k4, (2, emb), jnp.float32)
    out, enc_flat = fwd(params, x, style)
    out = jax.block_until_ready(out)
    enc_flat = jax.block_until_ready(enc_flat)
    out_ref, enc_flat_ref = reference_forward(params, x, style)
    assert out.shape == (2, input_nc + outer_nc, 2, 2)
    assert enc_flat.shape == (2, inner_nc + emb)
    assert jnp.allclose(out, out_ref, atol=2e-2, rtol=2e-2)
    assert jnp.allclose(enc_flat, enc_flat_ref, atol=1e-2, rtol=1e-2)

    print("KERNEL_OK")
</pallas_src>

<mosaic_0001>
module attributes {stable_mosaic.version = 11 : i64} {
  func.func @_downconv_kernel(%arg0: i32, %arg1: memref<1x9x9x8xbf16, #tpu.memory_space<vmem>>, %arg2: memref<1x9x9x8xbf16, #tpu.memory_space<vmem>>, %arg3: memref<64x128xbf16, #tpu.memory_space<vmem>>, %arg4: memref<1x64x128xf32, #tpu.memory_space<vmem>>) attributes {dimension_semantics = [#tpu.dimension_semantics<parallel>], iteration_bounds = array<i64: 2>, scalar_prefetch = 0 : i64, scratch_operands = 0 : i64, tpu.core_type = #tpu.core_type<tc>, window_params = [{transform_indices = @transform_0, window_bounds = array<i64: 1, 9, 9, 8>}, {transform_indices = @transform_1, window_bounds = array<i64: 1, 9, 9, 8>}, {pipeline_mode = #tpu.pipeline_mode<synchronous>, transform_indices = @transform_2, window_bounds = array<i64: 64, 128>}, {transform_indices = @transform_3, window_bounds = array<i64: 1, 64, 128>}]} {
    %cst = arith.constant 0.000000e+00 : f32
    %0 = vector.broadcast %cst : f32 to vector<64x128xf32>
    %c0 = arith.constant 0 : index
    %c0_0 = arith.constant 0 : index
    %c0_1 = arith.constant 0 : index
    %c0_2 = arith.constant 0 : index
    %1 = vector.load %arg1[%c0, %c0_0, %c0_1, %c0_2] : memref<1x9x9x8xbf16, #tpu.memory_space<vmem>>, vector<1x8x8x8xbf16>
    %2 = vector.shape_cast %1 : vector<1x8x8x8xbf16> to vector<8x8x8xbf16>
    %3 = vector.shape_cast %2 : vector<8x8x8xbf16> to vector<64x8xbf16>
    %c0_3 = arith.constant 0 : index
    %c0_4 = arith.constant 0 : index
    %4 = vector.load %arg3[%c0_3, %c0_4] : memref<64x128xbf16, #tpu.memory_space<vmem>>, vector<8x128xbf16>
    %cst_5 = arith.constant dense<0.000000e+00> : vector<64x128xf32>
    %5 = tpu.matmul %3, %4, %cst_5 {dimension_numbers = #tpu.dot_dimension_numbers<[1], [0], [0], [1], [0, 0, 1, 1], [], []>} : vector<64x8xbf16>, vector<8x128xbf16>, vector<64x128xf32> -> vector<64x128xf32>
    %6 = arith.addf %0, %5 : vector<64x128xf32>
    %c0_6 = arith.constant 0 : index
    %c0_7 = arith.constant 0 : index
    %c1 = arith.constant 1 : index
    %c0_8 = arith.constant 0 : index
    %7 = vector.load %arg1[%c0_6, %c0_7, %c1, %c0_8] : memref<1x9x9x8xbf16, #tpu.memory_space<vmem>>, vector<1x8x8x8xbf16>
    %8 = vector.shape_cast %7 : vector<1x8x8x8xbf16> to vector<8x8x8xbf16>
    %9 = vector.shape_cast %8 : vector<8x8x8xbf16> to vector<64x8xbf16>
    %c8 = arith.constant 8 : index
    %c0_9 = arith.constant 0 : index
    %10 = vector.load %arg3[%c8, %c0_9] : memref<64x128xbf16, #tpu.memory_space<vmem>>, vector<8x128xbf16>
    %cst_10 = arith.constant dense<0.000000e+00> : vector<64x128xf32>
    %11 = tpu.matmul %9, %10, %cst_10 {dimension_numbers = #tpu.dot_dimension_numbers<[1], [0], [0], [1], [0, 0, 1, 1], [], []>} : vector<64x8xbf16>, vector<8x128xbf16>, vector<64x128xf32> -> vector<64x128xf32>
    %12 = arith.addf %6, %11 : vector<64x128xf32>
    %c0_11 = arith.constant 0 : index
    %c0_12 = arith.constant 0 : index
    %c0_13 = arith.constant 0 : index
    %c0_14 = arith.constant 0 : index
    %13 = vector.load %arg2[%c0_11, %c0_12, %c0_13, %c0_14] : memref<1x9x9x8xbf16, #tpu.memory_space<vmem>>, vector<1x8x8x8xbf16>
    %14 = vector.shape_cast %13 : vector<1x8x8x8xbf16> to vector<8x8x8xbf16>
    %15 = vector.shape_cast %14 : vector<8x8x8xbf16> to vector<64x8xbf16>
    %c16 = arith.constant 16 : index
    %c0_15 = arith.constant 0 : index
    %16 = vector.load %arg3[%c16, %c0_15] : memref<64x128xbf16, #tpu.memory_space<vmem>>, vector<8x128xbf16>
    %cst_16 = arith.constant dense<0.000000e+00> : vector<64x128xf32>
    %17 = tpu.matmul %15, %16, %cst_16 {dimension_numbers = #tpu.dot_dimension_numbers<[1], [0], [0], [1], [0, 0, 1, 1], [], []>} : vector<64x8xbf16>, vector<8x128xbf16>, vector<64x128xf32> -> vector<64x128xf32>
    %18 = arith.addf %12, %17 : vector<64x128xf32>
    %c0_17 = arith.constant 0 : index
    %c0_18 = arith.constant 0 : index
    %c1_19 = arith.constant 1 : index
    %c0_20 = arith.constant 0 : index
    %19 = vector.load %arg2[%c0_17, %c0_18, %c1_19, %c0_20] : memref<1x9x9x8xbf16, #tpu.memory_space<vmem>>, vector<1x8x8x8xbf16>
    %20 = vector.shape_cast %19 : vector<1x8x8x8xbf16> to vector<8x8x8xbf16>
    %21 = vector.shape_cast %20 : vector<8x8x8xbf16> to vector<64x8xbf16>
    %c24 = arith.constant 24 : index
    %c0_21 = arith.constant 0 : index
    %22 = vector.load %arg3[%c24, %c0_21] : memref<64x128xbf16, #tpu.memory_space<vmem>>, vector<8x128xbf16>
    %cst_22 = arith.constant dense<0.000000e+00> : vector<64x128xf32>
    %23 = tpu.matmul %21, %22, %cst_22 {dimension_numbers = #tpu.dot_dimension_numbers<[1], [0], [0], [1], [0, 0, 1, 1], [], []>} : vector<64x8xbf16>, vector<8x128xbf16>, vector<64x128xf32> -> vector<64x128xf32>
    %24 = arith.addf %18, %23 : vector<64x128xf32>
    %c0_23 = arith.constant 0 : index
    %c1_24 = arith.constant 1 : index
    %c0_25 = arith.constant 0 : index
    %c0_26 = arith.constant 0 : index
    %25 = vector.load %arg1[%c0_23, %c1_24, %c0_25, %c0_26] : memref<1x9x9x8xbf16, #tpu.memory_space<vmem>>, vector<1x8x8x8xbf16>
    %26 = vector.shape_cast %25 : vector<1x8x8x8xbf16> to vector<8x8x8xbf16>
    %27 = vector.shape_cast %26 : vector<8x8x8xbf16> to vector<64x8xbf16>
    %c32 = arith.constant 32 : index
    %c0_27 = arith.constant 0 : index
    %28 = vector.load %arg3[%c32, %c0_27] : memref<64x128xbf16, #tpu.memory_space<vmem>>, vector<8x128xbf16>
    %cst_28 = arith.constant dense<0.000000e+00> : vector<64x128xf32>
    %29 = tpu.matmul %27, %28, %cst_28 {dimension_numbers = #tpu.dot_dimension_numbers<[1], [0], [0], [1], [0, 0, 1, 1], [], []>} : vector<64x8xbf16>, vector<8x128xbf16>, vector<64x128xf32> -> vector<64x128xf32>
    %30 = arith.addf %24, %29 : vector<64x128xf32>
    %c0_29 = arith.constant 0 : index
    %c1_30 = arith.constant 1 : index
    %c1_31 = arith.constant 1 : index
    %c0_32 = arith.constant 0 : index
    %31 = vector.load %arg1[%c0_29, %c1_30, %c1_31, %c0_32] : memref<1x9x9x8xbf16, #tpu.memory_space<vmem>>, vector<1x8x8x8xbf16>
    %32 = vector.shape_cast %31 : vector<1x8x8x8xbf16> to vector<8x8x8xbf16>
    %33 = vector.shape_cast %32 : vector<8x8x8xbf16> to vector<64x8xbf16>
    %c40 = arith.constant 40 : index
    %c0_33 = arith.constant 0 : index
    %34 = vector.load %arg3[%c40, %c0_33] : memref<64x128xbf16, #tpu.memory_space<vmem>>, vector<8x128xbf16>
    %cst_34 = arith.constant dense<0.000000e+00> : vector<64x128xf32>
    %35 = tpu.matmul %33, %34, %cst_34 {dimension_numbers = #tpu.dot_dimension_numbers<[1], [0], [0], [1], [0, 0, 1, 1], [], []>} : vector<64x8xbf16>, vector<8x128xbf16>, vector<64x128xf32> -> vector<64x128xf32>
    %36 = arith.addf %30, %35 : vector<64x128xf32>
    %c0_35 = arith.constant 0 : index
    %c1_36 = arith.constant 1 : index
    %c0_37 = arith.constant 0 : index
    %c0_38 = arith.constant 0 : index
    %37 = vector.load %arg2[%c0_35, %c1_36, %c0_37, %c0_38] : memref<1x9x9x8xbf16, #tpu.memory_space<vmem>>, vector<1x8x8x8xbf16>
    %38 = vector.shape_cast %37 : vector<1x8x8x8xbf16> to vector<8x8x8xbf16>
    %39 = vector.shape_cast %38 : vector<8x8x8xbf16> to vector<64x8xbf16>
    %c48 = arith.constant 48 : index
    %c0_39 = arith.constant 0 : index
    %40 = vector.load %arg3[%c48, %c0_39] : memref<64x128xbf16, #tpu.memory_space<vmem>>, vector<8x128xbf16>
    %cst_40 = arith.constant dense<0.000000e+00> : vector<64x128xf32>
    %41 = tpu.matmul %39, %40, %cst_40 {dimension_numbers = #tpu.dot_dimension_numbers<[1], [0], [0], [1], [0, 0, 1, 1], [], []>} : vector<64x8xbf16>, vector<8x128xbf16>, vector<64x128xf32> -> vector<64x128xf32>
    %42 = arith.addf %36, %41 : vector<64x128xf32>
    %c0_41 = arith.constant 0 : index
    %c1_42 = arith.constant 1 : index
    %c1_43 = arith.constant 1 : index
    %c0_44 = arith.constant 0 : index
    %43 = vector.load %arg2[%c0_41, %c1_42, %c1_43, %c0_44] : memref<1x9x9x8xbf16, #tpu.memory_space<vmem>>, vector<1x8x8x8xbf16>
    %44 = vector.shape_cast %43 : vector<1x8x8x8xbf16> to vector<8x8x8xbf16>
    %45 = vector.shape_cast %44 : vector<8x8x8xbf16> to vector<64x8xbf16>
    %c56 = arith.constant 56 : index
    %c0_45 = arith.constant 0 : index
    %46 = vector.load %arg3[%c56, %c0_45] : memref<64x128xbf16, #tpu.memory_space<vmem>>, vector<8x128xbf16>
    %cst_46 = arith.constant dense<0.000000e+00> : vector<64x128xf32>
    %47 = tpu.matmul %45, %46, %cst_46 {dimension_numbers = #tpu.dot_dimension_numbers<[1], [0], [0], [1], [0, 0, 1, 1], [], []>} : vector<64x8xbf16>, vector<8x128xbf16>, vector<64x128xf32> -> vector<64x128xf32>
    %48 = arith.addf %42, %47 : vector<64x128xf32>
    %c0_47 = arith.constant 0 : index
    %c0_48 = arith.constant 0 : index
    %c0_49 = arith.constant 0 : index
    %49 = vector.load %arg4[%c0_47, %c0_48, %c0_49] : memref<1x64x128xf32, #tpu.memory_space<vmem>>, vector<1x64x128xf32>
    %50 = vector.shape_cast %49 : vector<1x64x128xf32> to vector<64x128xf32>
    %51 = vector.shape_cast %48 : vector<64x128xf32> to vector<1x64x128xf32>
    tpu.vector_store %arg4[%c0_47, %c0_48, %c0_49], %51 {strides = array<i32>} : memref<1x64x128xf32, #tpu.memory_space<vmem>>, vector<1x64x128xf32>,
    return
  }
  func.func @transform_0(%arg0: i32) -> (i32, i32, i32, i32) {
    %c0_i32 = arith.constant 0 : i32
    %c0_i32_0 = arith.constant 0 : i32
    %c0_i32_1 = arith.constant 0 : i32
    %c0_i32_2 = arith.constant 0 : i32
    return %arg0, %c0_i32, %c0_i32_0, %c0_i32_1 : i32, i32, i32, i32
  }
  func.func @transform_1(%arg0: i32) -> (i32, i32, i32, i32) {
    %c0_i32 = arith.constant 0 : i32
    %c0_i32_0 = arith.constant 0 : i32
    %c0_i32_1 = arith.constant 0 : i32
    %c0_i32_2 = arith.constant 0 : i32
    return %arg0, %c0_i32, %c0_i32_0, %c0_i32_1 : i32, i32, i32, i32
  }
  func.func @transform_2(%arg0: i32) -> (i32, i32) {
    %c0_i32 = arith.constant 0 : i32
    %c0_i32_0 = arith.constant 0 : i32
    %c0_i32_1 = arith.constant 0 : i32
    return %c0_i32, %c0_i32_0 : i32, i32
  }
  func.func @transform_3(%arg0: i32) -> (i32, i32, i32) {
    %c0_i32 = arith.constant 0 : i32
    %c0_i32_0 = arith.constant 0 : i32
    %c0_i32_1 = arith.constant 0 : i32
    return %arg0, %c0_i32, %c0_i32_0 : i32, i32, i32
  }
}

</mosaic_0001>

<bundles_post_ra>
// kernel: unet_innermost_forward.1
= control target key start
LH: loop header
LB: loop body
LE: loop exit
PB: predicated region body
PF: predicated region fallthrough
CT: control target
= control target key end

     0   :  { %s1555_s12 = smov 0   ;;  %s1865_s0 = inlined_call_operand.vmem [shape: bf16[2,9,9,8], index: 0, kind: input, shape index: {}]   ;;  %s1866_s1 = inlined_call_operand.vmem [shape: bf16[2,9,9,8], index: 1, kind: input, shape index: {}]   ;;  %s1867_s2 = inlined_call_operand.vmem [shape: bf16[64,128], index: 2, kind: input, shape index: {}]   ;;  %s1868_s3 = inlined_call_operand.vmem [shape: f32[2,64,128], index: 3, kind: output, shape index: {}]  }
   0x1 LB: > { %s1346_s13 = sadd.s32 4294967295, %s1533_s12   ;;  %p1350_p0 = scmp.ge.s32.totalorder %s1533_s12, 1  ;;  %s1533_s12 = sphi %s1555_s12, %s13_s12  }
   0x2   : > { %p147_p1 = scmp.lt.s32.totalorder %s1533_s12, 3 }
   0x4   : > { %p148_p2 = pnand %p1350_p0, %p147_p1 }
   0x5   : > { %p176_p3 = scmp.lt.s32.totalorder (!%p148_p2), %s1346_s13, 1 }
   0x6   : > { %151 = sbr.rel (%p148_p2) target bundleno = 292 (0x124), region = 32 }
   0xb   : > { %vm350_vm0 = vcmask 1043456   ;;  %v455_v0 = vld [vmem:[%s1867_s2 + $0x8] sm:$0xf]  ;;  %v200_v2 = vld [vmem:[%s1867_s2] sm:$0xf]  ;;  %s1872_s13 = smov (!%p176_p3, %s1346_s13), 1 }
   0xc   : > { %v489_v1 = vsel %vm350_vm0, %v455_v0, 0  ;;  %v324_v3 = vld [vmem:[%s1867_s2 + $0x4] sm:$0xf]  ;;  %v416_v4 = vsel %vm350_vm0, %v200_v2, 0  ;;  %v656_v6 = vld [vmem:[%s1867_s2 + $0xc] sm:$0xf] }
   0xd   : > { %498 = vmatpush.bf16.msra.mxu2 %v489_v1  ;;  %v352_v5 = vsel %vm350_vm0, %v324_v3, 0  ;;  %425 = vmatpush.bf16.msra.mxu1 %v416_v4  ;;  %v682_v7 = vsel %vm350_vm0, %v656_v6, 0  ;;  %v1005_v8 = vld [vmem:[%s1867_s2 + $0x18] sm:$0xf]  ;;  %s1518_s24 = smul.u32 72, %s1872_s13  ;;  %vm337_vm1 = vcmask 64512  }
   0xe   : > { %361 = vmatpush.bf16.msra.mxu0 %v352_v5  ;;  %691 = vmatpush.bf16.msra.mxu3 %v682_v7  ;;  %v1039_v9 = vsel %vm350_vm0, %v1005_v8, 0  ;;  %v730_v10 = vld [vmem:[%s1867_s2 + $0x10] sm:$0xf]  ;;  %v1206_v12 = vld [vmem:[%s1867_s2 + $0x1c] sm:$0xf]  ;;  %s1501_s10 = sshll.u32 %s1872_s13, 6 }
   0xf   : > { %v764_v11 = vsel %vm350_vm0, %v730_v10, 0  ;;  %v931_v13 = vld [vmem:[%s1867_s2 + $0x14] sm:$0xf]  ;;  %s1599_s6 = scalar_lea.vmem %s1866_s1, %s1518_s24  ;;  %s1604_s9 = scalar_lea.vmem %s1865_s0, %s1518_s24  ;;  %vm209_vm2 = vsmask.f32 3328  ;;  %v1232_v14 = vsel %vm350_vm0, %v1206_v12, 0 }
  0x10   : > { %vm210_vm3 = vsmask.f32 7440  ;;  %v957_v15 = vsel %vm350_vm0, %v931_v13, 0  ;;  %v1381_v16 = vld [vmem:[%s1599_s6] sm:$0xf]  ;;  %s1839_s15 = scalar_lea.vmem %s1868_s3, %s1501_s10 }
  0x11   : > { %1048 = vmatpush.bf16.msrb.mxu2 %v1039_v9  ;;  %v1506_v17 = vld [vmem:[%s1599_s6 + $0x4] sm:$0xf0]  ;;  %v1361_v18 = vld [vmem:[%s1604_s9] sm:$0xf]  ;;  %966 = vmatpush.bf16.msrb.mxu1 %v957_v15  ;;  %v201_v24 = vld [vmem:[%s1604_s9 + $0x4] sm:$0x1] }
  0x12   : > { %773 = vmatpush.bf16.msrb.mxu0 %v764_v11  ;;  %1241 = vmatpush.bf16.msrb.mxu3 %v1232_v14  ;;  %v1382_v19 = vor.u32 %v1506_v17, %v1381_v16  ;;  %v1502_v20 = vld [vmem:[%s1604_s9 + $0x4] sm:$0xf0]  ;;  %v192_v21 = vld [vmem:[%s1604_s9] sm:$0xf]  ;;  %v202_v25 = vld [vmem:[%s1604_s9 + $0xc] sm:$0x1] }
  0x13   : > { %v193_v22 = vld [vmem:[%s1604_s9 + $0x8] sm:$0xf]  ;;  %v1362_v23 = vor.u32 %v1502_v20, %v1361_v18  ;;  %v213_v26 = vshrl.u32 %v192_v21, 16  ;;  %v216_v27 = vshll.u32 %v192_v21, 16  ;;  %v222_v28 = vshll.u32 %v201_v24, 16  ;;  %vm1627_vm4 = vmor %vm209_vm2, %vm210_vm3 }
  0x14   : > { %1395 = vmatmul.msk.bf16.vlgmr.msra.gmra.mxu2 %vm337_vm1, %v1382_v19  ;;  %v227_v29 = vshrl.u32 %v193_v22, 16  ;;  %v230_v30 = vshll.u32 %v193_v22, 16  ;;  %v236_v31 = vshll.u32 %v202_v25, 16  ;;  %v528_v32 = vld [vmem:[%s1599_s6] sm:$0xf] }
  0x15   : > { %1375 = vmatmul.msk.bf16.vlgmr.msra.gmra.mxu1 %vm337_vm1, %v1362_v23  ;;  %v215_v33 = vrot.slane %v213_v26, 4  ;;  %v218_v34 = vrot.slane %v216_v27, 5  ;;  %v529_v35 = vld [vmem:[%s1599_s6 + $0x4] sm:$0x1]  ;;  %v530_v36 = vld [vmem:[%s1599_s6 + $0x8] sm:$0xf] }
  0x16   : > { %v224_v37 = vrot.slane %v222_v28, 5  ;;  %v229_v38 = vrot.slane %v227_v29, 4  ;;  %v232_v39 = vrot.slane %v230_v30, 5  ;;  %v238_v40 = vrot.slane %v236_v31, 5  ;;  %v531_v41 = vld [vmem:[%s1599_s6 + $0xc] sm:$0x1] }
  0x17   : > { %v219_v42 = vor.u32 %v218_v34, %v215_v33  ;;  %v545_v43 = vshrl.u32 %v528_v32, 16  ;;  %v548_v44 = vshll.u32 %v528_v32, 16  ;;  %v554_v45 = vshll.u32 %v529_v35, 16  ;;  %v1623_v46 = vld [vmem:[%s1599_s6 + $0x10] sm:$0xf] }
  0x18   : > { %v233_v48 = vor.u32 %v232_v39, %v229_v38  ;;  %v559_v49 = vshrl.u32 %v530_v36, 16  ;;  %v562_v50 = vshll.u32 %v530_v36, 16  ;;  %v568_v51 = vshll.u32 %v531_v41, 16  ;;  %v1507_v52 = vld [vmem:[%s1599_s6 + $0x14] sm:$0xf0] }
  0x19   : > { %v220_v53 = vrot.slane %v219_v42, 4  ;;  %v547_v54 = vrot.slane %v545_v43, 4  ;;  %v550_v55 = vrot.slane %v548_v44, 5  ;;  %v556_v56 = vrot.slane %v554_v45, 5  ;;  %v1365_v57 = vld [vmem:[%s1604_s9 + $0x10] sm:$0xf] }
  0x1a   : > { %v234_v58 = vrot.slane %v233_v48, 4  ;;  %v561_v59 = vrot.slane %v559_v49, 4  ;;  %v564_v60 = vrot.slane %v562_v50, 5  ;;  %v570_v61 = vrot.slane %v568_v51, 5  ;;  %v1503_v62 = vld [vmem:[%s1604_s9 + $0x14] sm:$0xf0] }
  0x1b   : > { %v225_v63 = vsel %vm1627_vm4, %v220_v53, %v224_v37  ;;  %v551_v0 = vor.u32 %v550_v55, %v547_v54  ;;  %v1386_v1 = vor.u32 %v1507_v52, %v1623_v46  ;;  %v1366_v2 = vor.u32 %v1503_v62, %v1365_v57  ;;  %v194_v3 = vld [vmem:[%s1604_s9 + $0x10] sm:$0xf]  ;;  %v195_v4 = vld [vmem:[%s1604_s9 + $0x18] sm:$0xf]  ;;  %v203_v5 = vld [vmem:[%s1604_s9 + $0x14] sm:$0x1] }
  0x1c   : > { %v239_v6 = vsel %vm1627_vm4, %v234_v58, %v238_v40  ;;  %v325_v7 = vunpack.c.l.b16 %v225_v63  ;;  %v565_v8 = vor.u32 %v564_v60, %v561_v59  ;;  %v241_v9 = vshrl.u32 %v194_v3, 16  ;;  %v204_v12 = vld [vmem:[%s1604_s9 + $0x1c] sm:$0x1]  ;;  %v532_v19 = vld [vmem:[%s1599_s6 + $0x10] sm:$0xf] }
  0x1d   : > { %v326_v10 = vunpack.c.l.b16 %v239_v6  ;;  %v552_v11 = vrot.slane %v551_v0, 4  ;;  %v244_v13 = vshll.u32 %v194_v3, 16  ;;  %v250_v14 = vshll.u32 %v203_v5, 16  ;;  %v533_v24 = vld [vmem:[%s1599_s6 + $0x14] sm:$0x1] }
  0x1e   : > { %v566_v15 = vrot.slane %v565_v8, 4  ;;  %v243_v16 = vrot.slane %v241_v9, 4  ;;  %v255_v17 = vshrl.u32 %v195_v4, 16  ;;  %v258_v18 = vshll.u32 %v195_v4, 16  ;;  %v534_v25 = vld [vmem:[%s1599_s6 + $0x18] sm:$0xf] }
  0x1f   : > { %v333_v20 = vpack.c.b16 %v326_v10, %v325_v7  ;;  %v557_v21 = vsel %vm1627_vm4, %v552_v11, %v556_v56  ;;  %v246_v22 = vrot.slane %v244_v13, 5  ;;  %v252_v23 = vrot.slane %v250_v14, 5  ;;  %v535_v35 = vld [vmem:[%s1599_s6 + $0x1c] sm:$0x1]  ;;  %v196_v45 = vld [vmem:[%s1604_s9 + $0x20] sm:$0xf] }
  0x20   : > { %v571_v26 = vsel %vm1627_vm4, %v566_v15, %v570_v61  ;;  %v657_v27 = vunpack.c.l.b16 %v557_v21  ;;  %v257_v28 = vrot.slane %v255_v17, 4  ;;  %v260_v29 = vrot.slane %v258_v18, 5  ;;  %v197_v51 = vld [vmem:[%s1604_s9 + $0x28] sm:$0xf]  ;;  %v205_v60 = vld [vmem:[%s1604_s9 + $0x24] sm:$0x1] }
  0x21   : > { %1355 = vmatmul.msk.bf16.vlgmr.msra.gmra.mxu0 %vm337_vm1, %v333_v20  ;;  %v658_v30 = vunpack.c.l.b16 %v571_v26  ;;  %v247_v31 = vor.u32 %v246_v22, %v243_v16  ;;  %v264_v32 = vshll.u32 %v204_v12, 16  ;;  %v573_v33 = vshrl.u32 %v532_v19, 16  ;;  %v536_v3 = vld [vmem:[%s1599_s6 + $0x20] sm:$0xf]  ;;  %v206_v5 = vld [vmem:[%s1604_s9 + $0x2c] sm:$0x1] }
  0x22   : > { %v261_v34 = vor.u32 %v260_v29, %v257_v28  ;;  %v576_v36 = vshll.u32 %v532_v19, 16  ;;  %v582_v37 = vshll.u32 %v533_v24, 16  ;;  %v587_v38 = vshrl.u32 %v534_v25, 16  ;;  %v538_v8 = vld [vmem:[%s1599_s6 + $0x28] sm:$0xf] }
  0x23   : > { %v665_v39 = vpack.c.b16 %v658_v30, %v657_v27  ;;  %v248_v40 = vrot.slane %v247_v31, 4  ;;  %v266_v41 = vrot.slane %v264_v32, 5  ;;  %v575_v42 = vrot.slane %v573_v33, 4  ;;  %v1389_v14 = vld [vmem:[%s1599_s6 + $0x20] sm:$0xf] }
  0x24   : > { %1396 = vmatmul.msk.bf16.gmra.mxu2 %vm337_vm1, %v1386_v1  ;;  %v262_v43 = vrot.slane %v261_v34, 4  ;;  %v578_v44 = vrot.slane %v576_v36, 5  ;;  %v589_v48 = vrot.slane %v587_v38, 4  ;;  %v590_v49 = vshll.u32 %v534_v25, 16  ;;  %v1508_v15 = vld [vmem:[%s1599_s6 + $0x24] sm:$0xf0] }
  0x25   : > { %1399 = vmatmul.msk.bf16.vlgmr.msra.gmra.mxu3 %vm337_vm1, %v665_v39  ;;  %1376 = vmatmul.msk.bf16.gmra.mxu1 %vm337_vm1, %v1366_v2  ;;  %v253_v46 = vsel %vm1627_vm4, %v248_v40, %v252_v23  ;;  %v596_v50 = vshll.u32 %v535_v35, 16  ;;  %v584_v54 = vrot.slane %v582_v37, 5  ;;  %v269_v57 = vshrl.u32 %v196_v45, 16  ;;  %v1369_v19 = vld [vmem:[%s1604_s9 + $0x20] sm:$0xf] }
  0x26   : > { %v267_v52 = vsel %vm1627_vm4, %v262_v43, %v266_v41  ;;  %v579_v53 = vor.u32 %v578_v44, %v575_v42  ;;  %v327_v55 = vunpack.c.l.b16 %v253_v46  ;;  %v592_v56 = vrot.slane %v590_v49, 5  ;;  %v537_v22 = vld [vmem:[%s1599_s6 + $0x24] sm:$0x1]  ;;  %v1504_v25 = vld [vmem:[%s1604_s9 + $0x24] sm:$0xf0] }
  0x27   : > { %v328_v58 = vunpack.c.l.b16 %v267_v52  ;;  %v272_v61 = vshll.u32 %v196_v45, 16  ;;  %v283_v62 = vshrl.u32 %v197_v51, 16  ;;  %v598_v0 = vrot.slane %v596_v50, 5  ;;  %v539_v27 = vld [vmem:[%s1599_s6 + $0x2c] sm:$0x1] }
  0x28   : > { %v580_v59 = vrot.slane %v579_v53, 4  ;;  %v593_v63 = vor.u32 %v592_v56, %v589_v48  ;;  %v271_v1 = vrot.slane %v269_v57, 4  ;;  %v286_v2 = vshll.u32 %v197_v51, 16  ;;  %v198_v35 = vld [vmem:[%s1604_s9 + $0x30] sm:$0xf] }
  0x29   : > { %v274_v6 = vrot.slane %v272_v61, 5  ;;  %v285_v7 = vrot.slane %v283_v62, 4  ;;  %v278_v10 = vshll.u32 %v205_v60, 16  ;;  %v334_v12 = vpack.c.b16 %v328_v58, %v327_v55  ;;  %v199_v40 = vld [vmem:[%s1604_s9 + $0x38] sm:$0xf] }
  0x2a   : > { %v585_v4 = vsel %vm1627_vm4, %v580_v59, %v584_v54  ;;  %v594_v9 = vrot.slane %v593_v63, 4  ;;  %v288_v11 = vrot.slane %v286_v2, 5  ;;  %v601_v16 = vshrl.u32 %v536_v3, 16  ;;  %v207_v51 = vld [vmem:[%s1604_s9 + $0x34] sm:$0x1] }
  0x2b   : > { %v659_v13 = vunpack.c.l.b16 %v585_v4  ;;  %v604_v17 = vshll.u32 %v536_v3, 16  ;;  %v275_v20 = vor.u32 %v274_v6, %v271_v1  ;;  %v292_v21 = vshll.u32 %v206_v5, 16  ;;  %v540_v58 = vld [vmem:[%s1599_s6 + $0x30] sm:$0xf]  ;;  %v542_v63 = vld [vmem:[%s1599_s6 + $0x38] sm:$0xf] }
  0x2c   : > { %v599_v18 = vsel %vm1627_vm4, %v594_v9, %v598_v0  ;;  %v615_v23 = vshrl.u32 %v538_v8, 16  ;;  %v289_v26 = vor.u32 %v288_v11, %v285_v7  ;;  %v603_v28 = vrot.slane %v601_v16, 4  ;;  %v208_v0 = vld [vmem:[%s1604_s9 + $0x3c] sm:$0x1]  ;;  %v1393_v3 = vld [vmem:[%s1599_s6 + $0x30] sm:$0xf] }
  0x2d   : > { %v660_v24 = vunpack.c.l.b16 %v599_v18  ;;  %v606_v29 = vrot.slane %v604_v17, 5  ;;  %v618_v31 = vshll.u32 %v538_v8, 16  ;;  %v1390_v32 = vor.u32 %v1508_v15, %v1389_v14  ;;  %v1509_v4 = vld [vmem:[%s1599_s6 + $0x34] sm:$0xf0]  ;;  %v1431_v16 = vld [vmem:[%s1604_s9 + $0x8] sm:$0xf] }
  0x2e   : > { %v617_v30 = vrot.slane %v615_v23, 4  ;;  %v610_v34 = vshll.u32 %v537_v22, 16  ;;  %v1370_v37 = vor.u32 %v1504_v25, %v1369_v19  ;;  %v624_v39 = vshll.u32 %v539_v27, 16  ;;  %v1505_v19 = vld [vmem:[%s1604_s9 + $0x34] sm:$0xf0] }
  0x2f   : > { %v607_v33 = vor.u32 %v606_v29, %v603_v28  ;;  %v666_v36 = vpack.c.b16 %v660_v24, %v659_v13  ;;  %v620_v38 = vrot.slane %v618_v31, 5  ;;  %v276_v41 = vrot.slane %v275_v20, 4  ;;  %v541_v24 = vld [vmem:[%s1599_s6 + $0x34] sm:$0x1]  ;;  %v543_v28 = vld [vmem:[%s1599_s6 + $0x3c] sm:$0x1] }
  0x30   : > { %v280_v42 = vrot.slane %v278_v10, 5  ;;  %v290_v43 = vrot.slane %v289_v26, 4  ;;  %v294_v44 = vrot.slane %v292_v21, 5  ;;  %v297_v46 = vshrl.u32 %v198_v35, 16  ;;  %v1433_v21 = vld [vmem:[%s1604_s9 + $0x10] sm:$0xf] }
  0x31   : > { %1356 = vmatmul.msk.bf16.gmra.mxu0 %vm337_vm1, %v334_v12  ;;  %v621_v45 = vor.u32 %v620_v38, %v617_v30  ;;  %v300_v48 = vshll.u32 %v198_v35, 16  ;;  %v608_v49 = vrot.slane %v607_v33, 4  ;;  %v612_v50 = vrot.slane %v610_v34, 5  ;;  %v1373_v12 = vld [vmem:[%s1604_s9 + $0x30] sm:$0xf] }
  0x32   : > { %v311_v52 = vshrl.u32 %v199_v40, 16  ;;  %v314_v53 = vshll.u32 %v199_v40, 16  ;;  %v626_v55 = vrot.slane %v624_v39, 5  ;;  %v299_v56 = vrot.slane %v297_v46, 4  ;;  %v1432_v34 = vld [vmem:[%s1604_s9 + $0xc] sm:$0x1] }
  0x33   : > { %v622_v54 = vrot.slane %v621_v45, 4  ;;  %v302_v57 = vrot.slane %v300_v48, 5  ;;  %v281_v59 = vsel %vm1627_vm4, %v276_v41, %v280_v42  ;;  %v295_v60 = vsel %vm1627_vm4, %v290_v43, %v294_v44  ;;  %v1434_v39 = vld [vmem:[%s1604_s9 + $0x14] sm:$0x1] }
  0x34   : > { %1397 = vmatmul.msk.bf16.gmra.mxu2 %vm337_vm1, %v1390_v32  ;;  %v313_v61 = vrot.slane %v311_v52, 4  ;;  %v316_v62 = vrot.slane %v314_v53, 5  ;;  %v306_v1 = vshll.u32 %v207_v51, 16  ;;  %v613_v2 = vsel %vm1627_vm4, %v608_v49, %v612_v50 }
  0x35   : > { %1400 = vmatmul.msk.bf16.gmra.mxu3 %vm337_vm1, %v666_v36  ;;  %1377 = vmatmul.msk.bf16.gmra.mxu1 %vm337_vm1, %v1370_v37  ;;  %v303_v5 = vor.u32 %v302_v57, %v299_v56  ;;  %v629_v6 = vshrl.u32 %v540_v58, 16  ;;  %v632_v7 = vshll.u32 %v540_v58, 16  ;;  %v329_v8 = vunpack.c.l.b16 %v281_v59  ;;  %v1479_v58 = vld [vmem:[%s1599_s6 + $0x8] sm:$0xf]  ;;  %v1481_v59 = vld [vmem:[%s1599_s6 + $0x10] sm:$0xf] }
  0x36   : > { %v330_v9 = vunpack.c.l.b16 %v295_v60  ;;  %v627_v10 = vsel %vm1627_vm4, %v622_v54, %v626_v55  ;;  %v643_v11 = vshrl.u32 %v542_v63, 16  ;;  %v317_v13 = vor.u32 %v316_v62, %v313_v61 }
  0x37   : > { %v320_v14 = vshll.u32 %v208_v0, 16  ;;  %v646_v15 = vshll.u32 %v542_v63, 16  ;;  %v661_v17 = vunpack.c.l.b16 %v613_v2  ;;  %v1394_v18 = vor.u32 %v1509_v4, %v1393_v3  ;;  %v1435_v0 = vld [vmem:[%s1604_s9 + $0x18] sm:$0xf] }
  0x38   : > { %v308_v20 = vrot.slane %v306_v1, 5  ;;  %v662_v22 = vunpack.c.l.b16 %v627_v10  ;;  %v304_v23 = vrot.slane %v303_v5, 4  ;;  %v631_v25 = vrot.slane %v629_v6, 4  ;;  %v1437_v5 = vld [vmem:[%s1604_s9 + $0x20] sm:$0xf] }
  0x39   : > { %v634_v26 = vrot.slane %v632_v7, 5  ;;  %v335_v27 = vpack.c.b16 %v330_v9, %v329_v8  ;;  %v645_v29 = vrot.slane %v643_v11, 4  ;;  %v648_v30 = vrot.slane %v646_v15, 5 }
  0x3a   : > { %v820_v31 = vshrl.u32 %v1431_v16, 16  ;;  %v318_v32 = vrot.slane %v317_v13, 4  ;;  %v322_v33 = vrot.slane %v320_v14, 5  ;;  %v823_v35 = vshll.u32 %v1431_v16, 16  ;;  %v1461_v16 = vld [vmem:[%s1599_s6 + $0x8] sm:$0xf] }
  0x3b   : > { %v834_v36 = vshrl.u32 %v1433_v21, 16  ;;  %v1374_v37 = vor.u32 %v1505_v19, %v1373_v12  ;;  %v638_v38 = vshll.u32 %v541_v24, 16  ;;  %v837_v41 = vshll.u32 %v1433_v21, 16  ;;  %v1480_v21 = vld [vmem:[%s1599_s6 + $0xc] sm:$0x1] }
  0x3c   : > { %v822_v40 = vrot.slane %v820_v31, 4  ;;  %v667_v42 = vpack.c.b16 %v662_v22, %v661_v17  ;;  %v309_v43 = vsel %vm1627_vm4, %v304_v23, %v308_v20  ;;  %v635_v44 = vor.u32 %v634_v26, %v631_v25  ;;  %v1514_v17 = vld [vmem:[%s1599_s6 + $0xc] sm:$0xf0]  ;;  %v1482_v26 = vld [vmem:[%s1599_s6 + $0x14] sm:$0x1] }
  0x3d   : > { %v825_v45 = vrot.slane %v823_v35, 5  ;;  %v649_v46 = vor.u32 %v648_v30, %v645_v29  ;;  %v652_v48 = vshll.u32 %v543_v28, 16  ;;  %v836_v49 = vrot.slane %v834_v36, 4  ;;  %v1436_v35 = vld [vmem:[%s1604_s9 + $0x1c] sm:$0x1] }
  0x3e   : > { %v839_v50 = vrot.slane %v837_v41, 5  ;;  %v323_v51 = vsel %vm1627_vm4, %v318_v32, %v322_v33  ;;  %v829_v53 = vshll.u32 %v1432_v34, 16  ;;  %v843_v54 = vshll.u32 %v1434_v39, 16  ;;  %v1438_v36 = vld [vmem:[%s1604_s9 + $0x24] sm:$0x1] }
  0x3f   : > { %v826_v52 = vor.u32 %v825_v45, %v822_v40  ;;  %v331_v56 = vunpack.c.l.b16 %v309_v43  ;;  %v640_v57 = vrot.slane %v638_v38, 5  ;;  %v332_v60 = vunpack.c.l.b16 %v323_v51 }
  0x40   : > { %v840_v55 = vor.u32 %v839_v50, %v836_v49  ;;  %v636_v61 = vrot.slane %v635_v44, 4  ;;  %v650_v62 = vrot.slane %v649_v46, 4  ;;  %v654_v63 = vrot.slane %v652_v48, 5 }
  0x41   : > { %1357 = vmatmul.msk.bf16.gmra.mxu0 %vm337_vm1, %v335_v27  ;;  %v827_v1 = vrot.slane %v826_v52, 4  ;;  %v831_v2 = vrot.slane %v829_v53, 5  ;;  %v845_v4 = vrot.slane %v843_v54, 5  ;;  %v1095_v6 = vshrl.u32 %v1479_v58, 16 }
  0x42   : > { %v841_v3 = vrot.slane %v840_v55, 4  ;;  %v1098_v7 = vshll.u32 %v1479_v58, 16  ;;  %v1109_v8 = vshrl.u32 %v1481_v59, 16  ;;  %v1112_v9 = vshll.u32 %v1481_v59, 16  ;;  %v1485_v58 = vld [vmem:[%s1599_s6 + $0x20] sm:$0xf] }
  0x43   : > { %v848_v10 = vshrl.u32 %v1435_v0, 16  ;;  %v336_v11 = vpack.c.b16 %v332_v60, %v331_v56  ;;  %v641_v12 = vsel %vm1627_vm4, %v636_v61, %v640_v57  ;;  %v851_v13 = vshll.u32 %v1435_v0, 16  ;;  %v1483_v57 = vld [vmem:[%s1599_s6 + $0x18] sm:$0xf]  ;;  %v1439_v59 = vld [vmem:[%s1604_s9 + $0x28] sm:$0xf] }
  0x44   : > { %1398 = vmatmul.msk.bf16.gmra.mxu2 %vm337_vm1, %v1394_v18  ;;  %v862_v14 = vshrl.u32 %v1437_v5, 16  ;;  %v655_v15 = vsel %vm1627_vm4, %v650_v62, %v654_v63  ;;  %v832_v18 = vsel %vm1627_vm4, %v827_v1, %v831_v2  ;;  %v846_v19 = vsel %vm1627_vm4, %v841_v3, %v845_v4  ;;  %v1441_v60 = vld [vmem:[%s1604_s9 + $0x30] sm:$0xf]  ;;  %v1413_v61 = vld [vmem:[%s1604_s9 + $0x8] sm:$0xf] }
  0x45   : > { %1401 = vmatmul.msk.bf16.gmra.mxu3 %vm337_vm1, %v667_v42  ;;  %1378 = vmatmul.msk.bf16.gmra.mxu1 %vm337_vm1, %v1374_v37  ;;  %v865_v20 = vshll.u32 %v1437_v5, 16  ;;  %v1097_v22 = vrot.slane %v1095_v6, 4  ;;  %v1100_v23 = vrot.slane %v1098_v7, 5  ;;  %v1111_v24 = vrot.slane %v1109_v8, 4  ;;  %v1510_v62 = vld [vmem:[%s1604_s9 + $0xc] sm:$0xf0] }
  0x46   : > { %v1114_v25 = vrot.slane %v1112_v9, 5  ;;  %v850_v27 = vrot.slane %v848_v10, 4  ;;  %v853_v28 = vrot.slane %v851_v13, 5  ;;  %v864_v29 = vrot.slane %v862_v14, 4  ;;  %v1465_v14 = vld [vmem:[%s1599_s6 + $0x18] sm:$0xf] }
  0x47   : > { %v867_v30 = vrot.slane %v865_v20, 5  ;;  %v663_v31 = vunpack.c.l.b16 %v641_v12  ;;  %v664_v32 = vunpack.c.l.b16 %v655_v15  ;;  %v932_v33 = vunpack.c.l.b16 %v832_v18  ;;  %v1484_v20 = vld [vmem:[%s1599_s6 + $0x1c] sm:$0x1] }
  0x48   : > { %v933_v34 = vunpack.c.l.b16 %v846_v19  ;;  %v1462_v37 = vor.u32 %v1514_v17, %v1461_v16  ;;  %v1101_v38 = vor.u32 %v1100_v23, %v1097_v22  ;;  %v1104_v39 = vshll.u32 %v1480_v21, 16  ;;  %v1515_v17 = vld [vmem:[%s1599_s6 + $0x1c] sm:$0xf0]  ;;  %v1486_v23 = vld [vmem:[%s1599_s6 + $0x24] sm:$0x1] }
  0x49   : > { %v1115_v40 = vor.u32 %v1114_v25, %v1111_v24  ;;  %v1118_v41 = vshll.u32 %v1482_v26, 16  ;;  %v854_v42 = vor.u32 %v853_v28, %v850_v27  ;;  %v857_v43 = vshll.u32 %v1436_v35, 16  ;;  %v1440_v28 = vld [vmem:[%s1604_s9 + $0x2c] sm:$0x1] }
  0x4a   : > { %v868_v44 = vor.u32 %v867_v30, %v864_v29  ;;  %v871_v45 = vshll.u32 %v1438_v36, 16  ;;  %v668_v46 = vpack.c.b16 %v664_v32, %v663_v31  ;;  %v940_v48 = vpack.c.b16 %v933_v34, %v932_v33  ;;  %v1442_v29 = vld [vmem:[%s1604_s9 + $0x34] sm:$0x1] }
  0x4b   : > { %v1102_v49 = vrot.slane %v1101_v38, 4  ;;  %v1106_v50 = vrot.slane %v1104_v39, 5  ;;  %v1116_v51 = vrot.slane %v1115_v40, 4  ;;  %v1120_v52 = vrot.slane %v1118_v41, 5 }
  0x4c   : > { %v855_v53 = vrot.slane %v854_v42, 4  ;;  %v859_v54 = vrot.slane %v857_v43, 5  ;;  %v869_v55 = vrot.slane %v868_v44, 4  ;;  %v873_v56 = vrot.slane %v871_v45, 5 }
  0x4d   : > { %v1107_v63 = vsel %vm1627_vm4, %v1102_v49, %v1106_v50  ;;  %v1121_v0 = vsel %vm1627_vm4, %v1116_v51, %v1120_v52  ;;  %v1123_v1 = vshrl.u32 %v1483_v57, 16  ;;  %v1126_v2 = vshll.u32 %v1483_v57, 16  ;;  %v1487_v50 = vld [vmem:[%s1599_s6 + $0x28] sm:$0xf]  ;;  %v1489_v51 = vld [vmem:[%s1599_s6 + $0x30] sm:$0xf] }
  0x4e   : > { %v860_v3 = vsel %vm1627_vm4, %v855_v53, %v859_v54  ;;  %v874_v4 = vsel %vm1627_vm4, %v869_v55, %v873_v56  ;;  %v1137_v5 = vshrl.u32 %v1485_v58, 16  ;;  %v1140_v6 = vshll.u32 %v1485_v58, 16  ;;  %v1443_v52 = vld [vmem:[%s1604_s9 + $0x38] sm:$0xf]  ;;  %v1445_v53 = vld [vmem:[%s1604_s9 + $0x40] sm:$0xf] }
  0x4f   : > { %v876_v7 = vshrl.u32 %v1439_v59, 16  ;;  %v879_v8 = vshll.u32 %v1439_v59, 16  ;;  %v890_v9 = vshrl.u32 %v1441_v60, 16  ;;  %v893_v10 = vshll.u32 %v1441_v60, 16  ;;  %v1417_v54 = vld [vmem:[%s1604_s9 + $0x18] sm:$0xf] }
  0x50   : > { %v1207_v12 = vunpack.c.l.b16 %v1107_v63  ;;  %v1208_v13 = vunpack.c.l.b16 %v1121_v0  ;;  %v1125_v15 = vrot.slane %v1123_v1, 4  ;;  %v1128_v16 = vrot.slane %v1126_v2, 5  ;;  %v1511_v55 = vld [vmem:[%s1604_s9 + $0x1c] sm:$0xf0] }
  0x51   : > { %1358 = vmatmul.msk.bf16.gmra.mxu0 %vm337_vm1, %v336_v11  ;;  %v1414_v11 = vor.u32 %v1510_v62, %v1413_v61  ;;  %v934_v18 = vunpack.c.l.b16 %v860_v3  ;;  %v935_v19 = vunpack.c.l.b16 %v874_v4  ;;  %v1139_v21 = vrot.slane %v1137_v5, 4 }
  0x52   : > { %v1142_v22 = vrot.slane %v1140_v6, 5  ;;  %v878_v24 = vrot.slane %v876_v7, 4  ;;  %v881_v25 = vrot.slane %v879_v8, 5  ;;  %v892_v26 = vrot.slane %v890_v9, 4  ;;  %v1469_v7 = vld [vmem:[%s1599_s6 + $0x28] sm:$0xf] }
  0x53   : > { %v895_v27 = vrot.slane %v893_v10, 5  ;;  %v1215_v30 = vpack.c.b16 %v1208_v13, %v1207_v12  ;;  %v1466_v31 = vor.u32 %v1515_v17, %v1465_v14  ;;  %v1132_v32 = vshll.u32 %v1484_v20, 16  ;;  %v1516_v10 = vld [vmem:[%s1599_s6 + $0x2c] sm:$0xf0]  ;;  %v1488_v13 = vld [vmem:[%s1599_s6 + $0x2c] sm:$0x1] }
  0x54   : > { %1475 = vmatmul.msk.bf16.vlgmr.msrb.gmra.mxu2 %vm337_vm1, %v1462_v37  ;;  %v941_v33 = vpack.c.b16 %v935_v19, %v934_v18  ;;  %v1129_v34 = vor.u32 %v1128_v16, %v1125_v15  ;;  %v1143_v35 = vor.u32 %v1142_v22, %v1139_v21  ;;  %v1146_v36 = vshll.u32 %v1486_v23, 16  ;;  %v1490_v16 = vld [vmem:[%s1599_s6 + $0x34] sm:$0x1]  ;;  %v1444_v21 = vld [vmem:[%s1604_s9 + $0x3c] sm:$0x1] }
  0x55   : > { %1402 = vmatmul.msk.bf16.gmra.mxu3 %vm337_vm1, %v668_v46  ;;  %1447 = vmatmul.msk.bf16.vlgmr.msrb.gmra.mxu1 %vm337_vm1, %v940_v48  ;;  %v882_v37 = vor.u32 %v881_v25, %v878_v24  ;;  %v885_v38 = vshll.u32 %v1440_v28, 16  ;;  %v896_v39 = vor.u32 %v895_v27, %v892_v26  ;;  %v899_v40 = vshll.u32 %v1442_v29, 16  ;;  %v1446_v22 = vld [vmem:[%s1604_s9 + $0x44] sm:$0x1] }
  0x56   : > { %v1130_v41 = vrot.slane %v1129_v34, 4  ;;  %v1134_v42 = vrot.slane %v1132_v32, 5  ;;  %v1144_v43 = vrot.slane %v1143_v35, 4  ;;  %v1148_v44 = vrot.slane %v1146_v36, 5 }
  0x57   : > { %v883_v45 = vrot.slane %v882_v37, 4  ;;  %v887_v46 = vrot.slane %v885_v38, 5  ;;  %v897_v48 = vrot.slane %v896_v39, 4  ;;  %v901_v49 = vrot.slane %v899_v40, 5 }
  0x58   : > { %v1135_v56 = vsel %vm1627_vm4, %v1130_v41, %v1134_v42  ;;  %v1149_v57 = vsel %vm1627_vm4, %v1144_v43, %v1148_v44  ;;  %v1151_v58 = vshrl.u32 %v1487_v50, 16  ;;  %v1154_v59 = vshll.u32 %v1487_v50, 16  ;;  %v1491_v42 = vld [vmem:[%s1599_s6 + $0x38] sm:$0xf]  ;;  %v1493_v43 = vld [vmem:[%s1599_s6 + $0x40] sm:$0xf] }
  0x59   : > { %v888_v60 = vsel %vm1627_vm4, %v883_v45, %v887_v46  ;;  %v902_v61 = vsel %vm1627_vm4, %v897_v48, %v901_v49  ;;  %v1165_v62 = vshrl.u32 %v1489_v51, 16  ;;  %v1168_v63 = vshll.u32 %v1489_v51, 16  ;;  %v1421_v44 = vld [vmem:[%s1604_s9 + $0x28] sm:$0xf]  ;;  %v1512_v45 = vld [vmem:[%s1604_s9 + $0x2c] sm:$0xf0] }
  0x5a   : > { %v904_v0 = vshrl.u32 %v1443_v52, 16  ;;  %v907_v1 = vshll.u32 %v1443_v52, 16  ;;  %v918_v2 = vshrl.u32 %v1445_v53, 16  ;;  %v921_v3 = vshll.u32 %v1445_v53, 16 }
  0x5b   : > { %v1418_v4 = vor.u32 %v1511_v55, %v1417_v54  ;;  %v1209_v5 = vunpack.c.l.b16 %v1135_v56  ;;  %v1210_v6 = vunpack.c.l.b16 %v1149_v57  ;;  %v1153_v8 = vrot.slane %v1151_v58, 4  ;;  %v1473_v58 = vld [vmem:[%s1599_s6 + $0x38] sm:$0xf] }
  0x5c   : > { %v1156_v9 = vrot.slane %v1154_v59, 5  ;;  %v937_v12 = vunpack.c.l.b16 %v902_v61  ;;  %v1167_v14 = vrot.slane %v1165_v62, 4  ;;  %v1170_v15 = vrot.slane %v1168_v63, 5  ;;  %v1517_v59 = vld [vmem:[%s1599_s6 + $0x3c] sm:$0xf0] }
  0x5d   : > { %v906_v17 = vrot.slane %v904_v0, 4  ;;  %v909_v18 = vrot.slane %v907_v1, 5  ;;  %v920_v19 = vrot.slane %v918_v2, 4  ;;  %v923_v20 = vrot.slane %v921_v3, 5  ;;  %v1492_v2 = vld [vmem:[%s1599_s6 + $0x3c] sm:$0x1] }
  0x5e   : > { %v1216_v23 = vpack.c.b16 %v1210_v6, %v1209_v5  ;;  %v1470_v24 = vor.u32 %v1516_v10, %v1469_v7  ;;  %v1160_v25 = vshll.u32 %v1488_v13, 16  ;;  %v1157_v27 = vor.u32 %v1156_v9, %v1153_v8  ;;  %v1494_v3 = vld [vmem:[%s1599_s6 + $0x44] sm:$0x1] }
  0x5f   : > { %v1171_v28 = vor.u32 %v1170_v15, %v1167_v14  ;;  %v1174_v29 = vshll.u32 %v1490_v16, 16  ;;  %v924_v32 = vor.u32 %v923_v20, %v920_v19  ;;  %v1179_v49 = vshrl.u32 %v1491_v42, 16  ;;  %v1425_v15 = vld [vmem:[%s1604_s9 + $0x38] sm:$0xf]  ;;  %v1513_v16 = vld [vmem:[%s1604_s9 + $0x3c] sm:$0xf0] }
  0x60   : > { %v1158_v34 = vrot.slane %v1157_v27, 4  ;;  %v1162_v35 = vrot.slane %v1160_v25, 5  ;;  %v1182_v50 = vshll.u32 %v1491_v42, 16  ;;  %v1193_v53 = vshrl.u32 %v1493_v43, 16 }
  0x61   : > { %1427 = vmatmul.msk.bf16.vlgmr.msrb.gmra.mxu0 %vm337_vm1, %v1414_v11  ;;  %v936_v11 = vunpack.c.l.b16 %v888_v60  ;;  %v1172_v36 = vrot.slane %v1171_v28, 4  ;;  %v1176_v37 = vrot.slane %v1174_v29, 5  ;;  %v925_v40 = vrot.slane %v924_v32, 4 }
  0x62   : > { %v1163_v46 = vsel %vm1627_vm4, %v1158_v34, %v1162_v35  ;;  %v1196_v54 = vshll.u32 %v1493_v43, 16  ;;  %v1422_v55 = vor.u32 %v1512_v45, %v1421_v44  ;;  %v1181_v62 = vrot.slane %v1179_v49, 4 }
  0x63   : > { %v942_v26 = vpack.c.b16 %v937_v12, %v936_v11  ;;  %v1177_v48 = vsel %vm1627_vm4, %v1172_v36, %v1176_v37  ;;  %v1211_v56 = vunpack.c.l.b16 %v1163_v46  ;;  %v1184_v63 = vrot.slane %v1182_v50, 5 }
  0x64   : > { %1476 = vmatmul.msk.bf16.gmra.mxu2 %vm337_vm1, %v1466_v31  ;;  %v913_v31 = vshll.u32 %v1444_v21, 16  ;;  %v1212_v57 = vunpack.c.l.b16 %v1177_v48  ;;  %v1195_v0 = vrot.slane %v1193_v53, 4  ;;  %v1198_v1 = vrot.slane %v1196_v54, 5 }
  0x65   : > { %1495 = vmatmul.msk.bf16.vlgmr.msrb.gmra.mxu3 %vm337_vm1, %v1215_v30  ;;  %1448 = vmatmul.msk.bf16.gmra.mxu1 %vm337_vm1, %v941_v33  ;;  %v910_v30 = vor.u32 %v909_v18, %v906_v17  ;;  %v927_v33 = vshll.u32 %v1446_v22, 16  ;;  %v1185_v7 = vor.u32 %v1184_v63, %v1181_v62  ;;  %v1188_v8 = vshll.u32 %v1492_v2, 16 }
  0x66   : > { %v915_v39 = vrot.slane %v913_v31, 5  ;;  %v1217_v5 = vpack.c.b16 %v1212_v57, %v1211_v56  ;;  %v1199_v9 = vor.u32 %v1198_v1, %v1195_v0  ;;  %v1202_v10 = vshll.u32 %v1494_v3, 16 }
  0x67   : > { %v911_v38 = vrot.slane %v910_v30, 4  ;;  %v929_v41 = vrot.slane %v927_v33, 5  ;;  %v1186_v11 = vrot.slane %v1185_v7, 4  ;;  %v1190_v12 = vrot.slane %v1188_v8, 5 }
  0x68   : > { %v1200_v13 = vrot.slane %v1199_v9, 4  ;;  %v1204_v14 = vrot.slane %v1202_v10, 5  ;;  %v1426_v19 = vor.u32 %v1513_v16, %v1425_v15 }
  0x69   : > { %v916_v51 = vsel %vm1627_vm4, %v911_v38, %v915_v39  ;;  %v930_v52 = vsel %vm1627_vm4, %v925_v40, %v929_v41  ;;  %v1191_v17 = vsel %vm1627_vm4, %v1186_v11, %v1190_v12 }
  0x6a   : > { %v938_v60 = vunpack.c.l.b16 %v916_v51  ;;  %v939_v61 = vunpack.c.l.b16 %v930_v52  ;;  %v1205_v18 = vsel %vm1627_vm4, %v1200_v13, %v1204_v14  ;;  %v1213_v20 = vunpack.c.l.b16 %v1191_v17 }
  0x6b   : > { %v1214_v21 = vunpack.c.l.b16 %v1205_v18 }
  0x6c   : > { %v943_v6 = vpack.c.b16 %v939_v61, %v938_v60 }
  0x6d   : > { %v1218_v22 = vpack.c.b16 %v1214_v21, %v1213_v20 }
  0x71   : > { %1428 = vmatmul.msk.bf16.gmra.mxu0 %vm337_vm1, %v1418_v4  ;;  %v1474_v4 = vor.u32 %v1517_v59, %v1473_v58 }
  0x74   : > { %1477 = vmatmul.msk.bf16.gmra.mxu2 %vm337_vm1, %v1470_v24 }
  0x75   : > { %1496 = vmatmul.msk.bf16.gmra.mxu3 %vm337_vm1, %v1216_v23  ;;  %1449 = vmatmul.msk.bf16.gmra.mxu1 %vm337_vm1, %v942_v26 }
  0x81   : > { %1429 = vmatmul.msk.bf16.gmra.mxu0 %vm337_vm1, %v1422_v55 }
  0x84   : > { %1478 = vmatmul.msk.bf16.gmra.mxu2 %vm337_vm1, %v1474_v4 }
  0x85   : > { %1497 = vmatmul.msk.bf16.gmra.mxu3 %vm337_vm1, %v1217_v5  ;;  %1450 = vmatmul.msk.bf16.gmra.mxu1 %vm337_vm1, %v943_v6 }
  0x91   : > { %1430 = vmatmul.msk.bf16.gmra.mxu0 %vm337_vm1, %v1426_v19 }
  0x92   : > { %v427_v23 = vpop.f32.mrf.mxu1 }
  0x95   : > { %1498 = vmatmul.msk.bf16.gmra.mxu3 %vm337_vm1, %v1218_v22 }
  0x97   : > { %v500_v24 = vpop.f32.mrf.mxu2 }
  0x9a   : > { %v429_v25 = vpop.f32.mrf.mxu1 }
  0x9e   : > { %v363_v26 = vpop.f32.mrf.mxu0 }
  0x9f   : > { %v502_v27 = vpop.f32.mrf.mxu2  ;;  %v428_v54 = vadd.f32 %v427_v23, %v363_v26 }
  0xa1   : > { %v520_v57 = vadd.f32 %v500_v24, %v428_v54 }
  0xa2   : > { %v432_v28 = vpop.f32.mrf.mxu1 }
  0xa6   : > { %v365_v29 = vpop.f32.mrf.mxu0 }
  0xa7   : > { %v505_v30 = vpop.f32.mrf.mxu2  ;;  %v430_v61 = vadd.f32 %v429_v25, %v365_v29 }
  0xa8   : > { %v693_v31 = vpop.f32.mrf.mxu3 }
  0xa9   : > { %v713_v59 = vadd.f32 %v693_v31, %v520_v57  ;;  %v521_v2 = vadd.f32 %v502_v27, %v430_v61 }
  0xaa   : > { %v434_v32 = vpop.f32.mrf.mxu1 }
  0xae   : > { %v368_v47 = vpop.f32.mrf.mxu0 }
  0xaf   : > { %v507_v33 = vpop.f32.mrf.mxu2  ;;  %v433_v7 = vadd.f32 %v432_v28, %v368_v47 }
  0xb0   : > { %v695_v34 = vpop.f32.mrf.mxu3 }
  0xb1   : > { %v714_v3 = vadd.f32 %v695_v34, %v521_v2  ;;  %v522_v13 = vadd.f32 %v505_v30, %v433_v7 }
  0xb2   : > { %v437_v35 = vpop.f32.mrf.mxu1 }
  0xb6   : > { %v370_v36 = vpop.f32.mrf.mxu0 }
  0xb7   : > { %v1809_v37 = vpop.f32.mrf.mxu2  ;;  %v435_v17 = vadd.f32 %v434_v32, %v370_v36 }
  0xb8   : > { %v698_v38 = vpop.f32.mrf.mxu3 }
  0xb9   : > { %v715_v14 = vadd.f32 %v698_v38, %v522_v13  ;;  %v523_v23 = vadd.f32 %v507_v33, %v435_v17 }
  0xba   : > { %v1811_v39 = vpop.f32.mrf.mxu1 }
  0xbe   : > { %v373_v40 = vpop.f32.mrf.mxu0 }
  0xbf   : > { %v1813_v41 = vpop.f32.mrf.mxu2  ;;  %v438_v28 = vadd.f32 %v437_v35, %v373_v40 }
  0xc0   : > { %v700_v42 = vpop.f32.mrf.mxu3 }
  0xc1   : > { %v716_v25 = vadd.f32 %v700_v42, %v523_v23  ;;  %v524_v32 = vadd.f32 %v1809_v37, %v438_v28 }
  0xc2   : > { %v1815_v43 = vpop.f32.mrf.mxu1 }
  0xc6   : > { %v1817_v44 = vpop.f32.mrf.mxu0 }
  0xc7   : > { %v1819_v45 = vpop.f32.mrf.mxu2  ;;  %v440_v33 = vadd.f32 %v1811_v39, %v1817_v44 }
  0xc8   : > { %v703_v46 = vpop.f32.mrf.mxu3 }
  0xc9   : > { %v717_v36 = vadd.f32 %v703_v46, %v524_v32  ;;  %v525_v57 = vadd.f32 %v1813_v41, %v440_v33 }
  0xca   : > { %v1821_v48 = vpop.f32.mrf.mxu1 }
  0xce   : > { %v1823_v49 = vpop.f32.mrf.mxu0 }
  0xcf   : > { %v1825_v50 = vpop.f32.mrf.mxu2  ;;  %v443_v46 = vadd.f32 %v1815_v43, %v1823_v49 }
  0xd0   : > { %v1827_v51 = vpop.f32.mrf.mxu3 }
  0xd2   : > { %v968_v52 = vpop.f32.mrf.mxu1 }
  0xd6   : > { %v1829_v53 = vpop.f32.mrf.mxu0 }
  0xd7   : > { %v1050_v55 = vpop.f32.mrf.mxu2 }
  0xd8   : > { %v1831_v56 = vpop.f32.mrf.mxu3 }
  0xda   : > { %v970_v58 = vpop.f32.mrf.mxu1 }
  0xde   : > { %v775_v60 = vpop.f32.mrf.mxu0 }
  0xdf   : > { %v795_v62 = vadd.f32 %v775_v60, %v713_v59  ;;  %v1052_v0 = vpop.f32.mrf.mxu2  ;;  %v718_v59 = vadd.f32 %v1827_v51, %v525_v57  ;;  %v445_v51 = vadd.f32 %v1821_v48, %v1829_v53 }
  0xe0   : > { %v1833_v63 = vpop.f32.mrf.mxu3 }
  0xe1   : > { %v988_v1 = vadd.f32 %v968_v52, %v795_v62 }
  0xe2   : > { %v973_v6 = vpop.f32.mrf.mxu1 }
  0xe3   : > { %v1070_v4 = vadd.f32 %v1050_v55, %v988_v1  ;;  %v526_v1 = vadd.f32 %v1819_v45, %v443_v46 }
  0xe5   : > { %v719_v41 = vadd.f32 %v1831_v56, %v526_v1 }
  0xe6   : > { %v777_v5 = vpop.f32.mrf.mxu0 }
  0xe7   : > { %v796_v8 = vadd.f32 %v777_v5, %v714_v3  ;;  %v1055_v12 = vpop.f32.mrf.mxu2 }
  0xe8   : > { %v1243_v9 = vpop.f32.mrf.mxu3 }
  0xe9   : > { %v1263_v10 = vadd.f32 %v1243_v9, %v1070_v4  ;;  %v989_v11 = vadd.f32 %v970_v58, %v796_v8  ;;  %v527_v8 = vadd.f32 %v1825_v50, %v445_v51 }
  0xea   : > { %v975_v20 = vpop.f32.mrf.mxu1 }
  0xeb   : > { %1271 = vst [vmem:[%s1839_s15] sm:$0xff] %v1263_v10  ;;  %v1071_v15 = vadd.f32 %v1052_v0, %v989_v11  ;;  %v720_v45 = vadd.f32 %v1833_v63, %v527_v8 }
  0xee   : > { %v780_v16 = vpop.f32.mrf.mxu0 }
  0xef   : > { %v797_v18 = vadd.f32 %v780_v16, %v715_v14  ;;  %v1057_v24 = vpop.f32.mrf.mxu2 }
  0xf0   : > { %v1245_v19 = vpop.f32.mrf.mxu3 }
  0xf1   : > { %v1264_v21 = vadd.f32 %v1245_v19, %v1071_v15  ;;  %v990_v22 = vadd.f32 %v973_v6, %v797_v18 }
  0xf2   : > { %v978_v34 = vpop.f32.mrf.mxu1 }
  0xf3   : > { %1272 = vst [vmem:[%s1839_s15 + $0x8] sm:$0xff] %v1264_v21  ;;  %v1072_v26 = vadd.f32 %v1055_v12, %v990_v22 }
  0xf6   : > { %v782_v27 = vpop.f32.mrf.mxu0 }
  0xf7   : > { %v798_v29 = vadd.f32 %v782_v27, %v716_v25  ;;  %v1060_v52 = vpop.f32.mrf.mxu2 }
  0xf8   : > { %v1248_v30 = vpop.f32.mrf.mxu3 }
  0xf9   : > { %v1265_v31 = vadd.f32 %v1248_v30, %v1072_v26  ;;  %v991_v47 = vadd.f32 %v975_v20, %v798_v29 }
  0xfa   : > { %v980_v58 = vpop.f32.mrf.mxu1 }
  0xfb   : > { %1273 = vst [vmem:[%s1839_s15 + $0x10] sm:$0xff] %v1265_v31  ;;  %v1073_v38 = vadd.f32 %v1057_v24, %v991_v47 }
  0xfe   : > { %v785_v54 = vpop.f32.mrf.mxu0 }
  0xff   : > { %v799_v42 = vadd.f32 %v785_v54, %v717_v36  ;;  %v1062_v62 = vpop.f32.mrf.mxu2 }
 0x100   : > { %v1250_v55 = vpop.f32.mrf.mxu3 }
 0x101   : > { %v1266_v35 = vadd.f32 %v1250_v55, %v1073_v38  ;;  %v992_v40 = vadd.f32 %v978_v34, %v799_v42 }
 0x102   : > { %v983_v3 = vpop.f32.mrf.mxu1 }
 0x103   : > { %1274 = vst [vmem:[%s1839_s15 + $0x18] sm:$0xff] %v1266_v35  ;;  %v1074_v37 = vadd.f32 %v1060_v52, %v992_v40 }
 0x106   : > { %v787_v60 = vpop.f32.mrf.mxu0 }
 0x107   : > { %v800_v61 = vadd.f32 %v787_v60, %v718_v59  ;;  %v1065_v7 = vpop.f32.mrf.mxu2 }
 0x108   : > { %v1253_v0 = vpop.f32.mrf.mxu3 }
 0x109   : > { %v1267_v39 = vadd.f32 %v1253_v0, %v1074_v37  ;;  %v993_v44 = vadd.f32 %v980_v58, %v800_v61 }
 0x10a   : > { %v985_v11 = vpop.f32.mrf.mxu1 }
 0x10b   : > { %1275 = vst [vmem:[%s1839_s15 + $0x20] sm:$0xff] %v1267_v39  ;;  %v1075_v2 = vadd.f32 %v1062_v62, %v993_v44 }
 0x10e   : > { %v790_v4 = vpop.f32.mrf.mxu0 }
 0x10f   : > { %v801_v5 = vadd.f32 %v790_v4, %v719_v41  ;;  %v1067_v48 = vpop.f32.mrf.mxu2 }
 0x110   : > { %v1255_v43 = vpop.f32.mrf.mxu3 }
 0x111   : > { %v1268_v49 = vadd.f32 %v1255_v43, %v1075_v2  ;;  %v994_v6 = vadd.f32 %v983_v3, %v801_v5 }
 0x113   : > { %1276 = vst [vmem:[%s1839_s15 + $0x28] sm:$0xff] %v1268_v49  ;;  %v1076_v9 = vadd.f32 %v1065_v7, %v994_v6 }
 0x116   : > { %v792_v56 = vpop.f32.mrf.mxu0 }
 0x117   : > { %v802_v10 = vadd.f32 %v792_v56, %v720_v45 }
 0x118   : > { %v1258_v12 = vpop.f32.mrf.mxu3 }
 0x119   : > { %v1269_v13 = vadd.f32 %v1258_v12, %v1076_v9  ;;  %v995_v14 = vadd.f32 %v985_v11, %v802_v10 }
 0x11b   : > { %1277 = vst [vmem:[%s1839_s15 + $0x30] sm:$0xff] %v1269_v13  ;;  %v1077_v53 = vadd.f32 %v1067_v48, %v995_v14 }
 0x120   : > { %v1260_v15 = vpop.f32.mrf.mxu3 }
 0x121   : > { %v1270_v16 = vadd.f32 %v1260_v15, %v1077_v53 }
 0x123   : > { %1278 = vst [vmem:[%s1839_s15 + $0x38] sm:$0xff] %v1270_v16 }
 0x124 PF: > { %s13_s12 = sadd.s32 1, %s1533_s12  }
 0x125   : > { %p10_p4 = scmp.ge.s32.totalorder %s13_s12, 4  }
 0x127   :  { %12 = sbr.rel (!%p10_p4) target bundleno = 1 (0x1), region = 67 }

</bundles_post_ra>
